<compile_context>
chip_gen: v7x
topology: tpu7x:2x2x1
jax: 0.10.0
libtpu: 0.0.40
codegen_flags: <defaults>
</compile_context>

<pallas_src>
import functools

import jax
import jax.numpy as jnp
from jax.experimental import pallas as pl
from jax.experimental.pallas import tpu as pltpu


# ----------------------------------------------------------------------------
# Kernel helpers
# ----------------------------------------------------------------------------
def _bn_train(x, gamma, beta, eps=1e-5):
    # BatchNorm1d in training mode: batch mean, biased batch variance.
    mean = jnp.mean(x, axis=0, keepdims=True)
    var = jnp.mean((x - mean) * (x - mean), axis=0, keepdims=True)
    return (x - mean) * jax.lax.rsqrt(var + eps) * gamma + beta


# ----------------------------------------------------------------------------
# Pallas kernel: embeddings + both towers + batchnorm + cosine similarity
# ----------------------------------------------------------------------------
def dssm_kernel(idx_ref, wemb_ref, w1_ref, w2_ref, w3_ref, vec_ref, out_ref):
    f32 = jnp.float32
    B = idx_ref.shape[0]
    n_cols = idx_ref.shape[1]
    VT = wemb_ref.shape[0]          # total padded vocab (multiple of 128)
    H0 = w1_ref.shape[1] // 2
    H1 = w2_ref.shape[1]
    H2 = w3_ref.shape[1]

    # ---- fused embedding lookup ------------------------------------------
    # idx already carries the vocab-block offsets (folded in the wrapper), so
    # the multi-hot is a plain equality against a lane iota. Accumulate the
    # (duplicate-counting) mask in int32 and convert to f32 once; one matmul
    # against the block-structured embedding matrix replaces 5 gathers,
    # 3 sequence sums and 2 concats. Padded rows of w_emb are zero.
    idx = idx_ref[...]                                            # (B, 13) i32
    lane = jax.lax.broadcasted_iota(jnp.int32, (B, VT), 1)
    cnt = (idx[:, 0:1] == lane).astype(jnp.int32)                 # seed, no zeros init
    for col in range(1, n_cols):                                  # 12 more compares
        cnt = cnt + (idx[:, col:col + 1] == lane).astype(jnp.int32)
    x = cnt.astype(f32)                                           # single f32 cast
    cat_in = jnp.dot(x, wemb_ref[...], preferred_element_type=f32)  # (B, 7E)=[user|item]

    # ---- packed small params: [b1u|b1i | b2 | b3 | gamma | beta] ----------
    vec = vec_ref[...]
    o = 0
    b1 = vec[:, o:o + 2 * H0]; o += 2 * H0
    b2 = vec[:, o:o + H1];     o += H1
    b3 = vec[:, o:o + H2];     o += H2
    gamma = vec[:, o:o + H0];  o += H0
    beta = vec[:, o:o + H0]

    # ---- layer 1, both towers at once (block-diagonal weight) -------------
    z1 = jnp.tanh(jnp.dot(cat_in, w1_ref[...], preferred_element_type=f32) + b1)  # (B, 2H0)
    u1 = _bn_train(z1[:, :H0], gamma, beta)     # user tower: BN (train mode)
    i1 = z1[:, H0:]                             # item tower: no BN

    # ---- shared layers 2 & 3: stack towers along batch, one matmul each ---
    s1 = jnp.concatenate([u1, i1], axis=0)                                  # (2B, H0)
    z2 = jnp.tanh(jnp.dot(s1, w2_ref[...], preferred_element_type=f32) + b2)
    s2 = jnp.concatenate([_bn_train(z2[:B], gamma, beta), z2[B:]], axis=0)  # BN user half only
    z3 = jnp.tanh(jnp.dot(s2, w3_ref[...], preferred_element_type=f32) + b3)  # (2B, H2)
    out_user = z3[:B]
    out_item = z3[B:]

    # ---- cosine similarity (dim=1, eps=1e-8), lane-dense (1, B) output ----
    # Row-sums are produced transposed via an NT matmul (ones @ M^T) so batch
    # lands on the lane axis; rsqrt(max(su*si, eps^2)) == 1/max(||u||*||v||, eps).
    prods = jnp.concatenate(
        [out_user * out_item, out_user * out_user, out_item * out_item], axis=0)  # (3B, H2)
    ones_lhs = jnp.ones((8, H2), f32)
    nt_dims = (((1,), (1,)), ((), ()))
    r = jax.lax.dot_general(ones_lhs, prods, nt_dims,
                            preferred_element_type=f32)[0:1]      # (1, 3B)
    dots = r[:, :B]
    su = r[:, B:2 * B]
    si = r[:, 2 * B:]
    eps = 1e-8
    out_ref[...] = dots * jax.lax.rsqrt(jnp.maximum(su * si, eps * eps))


# ----------------------------------------------------------------------------
# Parameter construction (mirrors DSSM.__init__) and one-time folding
# ----------------------------------------------------------------------------
def init_params(key, feature_size, embedding_dim=8, hidden_dims=(8, 8, 8)):
    E = embedding_dim
    H0, H1, H2 = hidden_dims
    ks = jax.random.split(key, 16)

    def emb(k, vocab):
        return jax.random.normal(k, (vocab, E), jnp.float32)

    def lin(kw, kb, fan_in, fan_out):
        bound = 1.0 / jnp.sqrt(fan_in)
        w = jax.random.uniform(kw, (fan_in, fan_out), jnp.float32, -bound, bound)
        b = jax.random.uniform(kb, (1, fan_out), jnp.float32, -bound, bound)
        return w, b

    params = {}
    params["embed_sex"] = emb(ks[0], feature_size[0])
    params["embed_level_id"] = emb(ks[1], feature_size[1])
    # padding_idx=0 rows zeroed (nn.Embedding init behavior)
    params["embed_shop_id"] = emb(ks[2], feature_size[2] + 1).at[0].set(0.0)
    params["embed_cate"] = emb(ks[3], feature_size[3] + 2).at[0].set(0.0)
    params["embed_floor"] = emb(ks[4], feature_size[4] + 1).at[0].set(0.0)

    params["w1u"], params["b1u"] = lin(ks[5], ks[6], E * 5, H0)
    params["w1i"], params["b1i"] = lin(ks[7], ks[8], E * 2, H0)
    params["w2"], params["b2"] = lin(ks[9], ks[10], H0, H1)
    params["w3"], params["b3"] = lin(ks[11], ks[12], H1, H2)

    params["bn_gamma"] = jnp.ones((1, H0), jnp.float32)
    params["bn_beta"] = jnp.zeros((1, H0), jnp.float32)
    return params


def fold_params(params):
    """One-time fold of the raw weights into the fused kernel operands."""
    E = params["embed_sex"].shape[1]
    H0 = params["w1u"].shape[1]
    # 7 vocab blocks in kernel order:
    #   [sex, level, shop(seq), cate(seq), floor(seq), cand_shop, cand_cate]
    tables = [params["embed_sex"], params["embed_level_id"], params["embed_shop_id"],
              params["embed_cate"], params["embed_floor"],
              params["embed_shop_id"], params["embed_cate"]]
    vocabs = tuple(int(t.shape[0]) for t in tables)
    vt = sum(vocabs)
    # Pad total vocab rows to a multiple of 128: keeps the one-hot contraction
    # dim / multi-hot lane dim tile-aligned; padded rows are zero (no-op).
    vt_pad = ((vt + 127) // 128) * 128
    n_blk = len(tables)

    # Block-structured embedding matrix: multi-hot @ w_emb == [user_in | item_in]
    w_emb = jnp.zeros((vt_pad, n_blk * E), jnp.float32)
    row = 0
    for k, t in enumerate(tables):
        v = int(t.shape[0])
        w_emb = w_emb.at[row:row + v, k * E:(k + 1) * E].set(t)
        row += v

    # Block-diagonal layer-1 weight: user (5E->H0) | item (2E->H0)
    w1 = jnp.zeros((n_blk * E, 2 * H0), jnp.float32)
    w1 = w1.at[:5 * E, :H0].set(params["w1u"])
    w1 = w1.at[5 * E:, H0:].set(params["w1i"])

    # Packed small vector params: [b1u | b1i | b2 | b3 | gamma | beta]
    vec = jnp.concatenate([params["b1u"], params["b1i"], params["b2"],
                           params["b3"], params["bn_gamma"], params["bn_beta"]],
                          axis=1)

    fused = {"w_emb": w_emb, "w1": w1, "w2": params["w2"], "w3": params["w3"],
             "vec": vec}
    return fused, vocabs


# ----------------------------------------------------------------------------
# Forward pass wrapper
# ----------------------------------------------------------------------------
@functools.partial(jax.jit, static_argnames=("vocabs",))
def dssm_forward(fused, cat_fea_sex, cat_fea_level_id, iter_fea_shop_id,
                 iter_fea_cate, iter_fea_floor, candidate_shop_id, candidate_cate,
                 *, vocabs):
    B = cat_fea_sex.shape[0]
    # Tile-alignment note: B should be a multiple of 8 (f32 sublane tile) so the
    # in-kernel batch slices / axis-0 concats stay on (8,128) boundaries; other
    # B is still correct, just triggers relayout copies.

    # Pack every integer feature into one (B, 13) int32 matrix and fold the
    # static vocab-block offsets in here (one broadcast add) so the kernel's
    # one-hot compares need no per-column offsets.
    idx = jnp.concatenate(
        [cat_fea_sex[:, None], cat_fea_level_id[:, None],
         iter_fea_shop_id, iter_fea_cate, iter_fea_floor,
         candidate_shop_id[:, None], candidate_cate[:, None]],
        axis=1).astype(jnp.int32)

    seq_lens = (1, 1, int(iter_fea_shop_id.shape[1]), int(iter_fea_cate.shape[1]),
                int(iter_fea_floor.shape[1]), 1, 1)
    col_offsets = []
    acc = 0
    for v, n_cols in zip(vocabs, seq_lens):
        col_offsets.extend([acc] * n_cols)
        acc += v
    vt_pad = int(fused["w_emb"].shape[0])
    assert acc <= vt_pad
    assert len(col_offsets) == idx.shape[1]
    idx = idx + jnp.asarray(col_offsets, jnp.int32)[None, :]

    # Static shape-derived scheduling / VMEM hints.
    n_emb_cols = int(fused["w_emb"].shape[1])      # 7*E
    h0 = int(fused["w1"].shape[1]) // 2
    h1 = int(fused["w2"].shape[1])
    h2 = int(fused["w3"].shape[1])
    flops = int(2 * B * vt_pad * n_emb_cols            # one-hot @ w_emb
                + 2 * B * n_emb_cols * 2 * h0          # block-diag layer 1
                + 2 * (2 * B) * h0 * h1                # shared fc2
                + 2 * (2 * B) * h1 * h2                # shared fc3
                + 2 * 8 * h2 * 3 * B)                  # cosine row-sums
    transcendentals = int(B * 2 * h0 + 2 * B * h1 + 2 * B * h2 + 3 * B)
    bytes_accessed = int(4 * (idx.size + fused["w_emb"].size + fused["w1"].size +
                              fused["w2"].size + fused["w3"].size +
                              fused["vec"].size + B))
    cost = pl.CostEstimate(flops=flops, transcendentals=transcendentals,
                           bytes_accessed=bytes_accessed)
    # Explicit scoped-VMEM budget (don't rely on the 16/32 MiB default once
    # the embedding matrix grows); generous multiplier for f32 intermediates.
    vmem_limit = int(min(6 * bytes_accessed + (8 << 20), 96 << 20))
    cparams = pltpu.CompilerParams(vmem_limit_bytes=vmem_limit)

    vmem = pl.BlockSpec(memory_space=pltpu.MemorySpace.VMEM)

    # Single block: tiny shapes + training-mode BatchNorm needs full-batch
    # statistics (see TODOs at top for the large-B batch-grid plan).
    out = pl.pallas_call(
        dssm_kernel,
        out_shape=jax.ShapeDtypeStruct((1, B), jnp.float32),
        in_specs=[vmem] * 6,
        out_specs=vmem,
        compiler_params=cparams,
        cost_estimate=cost,
    )(idx, fused["w_emb"], fused["w1"], fused["w2"], fused["w3"], fused["vec"])
    return out[0]  # (B,)


# ----------------------------------------------------------------------------
# Pure-JAX reference (mirrors the PyTorch forward) for a sanity check
# ----------------------------------------------------------------------------
def dssm_reference(params, sex, lvl, shop, cate, floor, cshop, ccate):
    def bn(x):
        m = x.mean(0, keepdims=True)
        v = ((x - m) ** 2).mean(0, keepdims=True)
        return (x - m) * jax.lax.rsqrt(v + 1e-5) * params["bn_gamma"] + params["bn_beta"]

    def dot(a, b):
        return jnp.dot(a, b, precision="highest")

    u_in = jnp.concatenate(
        [params["embed_sex"][sex], params["embed_level_id"][lvl],
         params["embed_shop_id"][shop].sum(1), params["embed_cate"][cate].sum(1),
         params["embed_floor"][floor].sum(1)], axis=1)
    i_in = jnp.concatenate(
        [params["embed_shop_id"][cshop], params["embed_cate"][ccate]], axis=1)

    u = jnp.tanh(dot(u_in, params["w1u"]) + params["b1u"])
    u = bn(u)
    u = jnp.tanh(dot(u, params["w2"]) + params["b2"])
    u = bn(u)
    u = jnp.tanh(dot(u, params["w3"]) + params["b3"])

    it = jnp.tanh(dot(i_in, params["w1i"]) + params["b1i"])
    it = jnp.tanh(dot(it, params["w2"]) + params["b2"])
    it = jnp.tanh(dot(it, params["w3"]) + params["b3"])

    num = (u * it).sum(1)
    den = jnp.maximum(jnp.sqrt((u * u).sum(1)) * jnp.sqrt((it * it).sum(1)), 1e-8)
    return num / den


if __name__ == "__main__":
    feature_size = [3, 5, 10, 12, 6]   # [sex, level, shop, cate, floor] vocab sizes
    embedding_dim = 8
    hidden_dims = (8, 8, 8)
    B = 8
    L_SHOP, L_CATE, L_FLOOR = 4, 3, 2

    key = jax.random.PRNGKey(0)
    kp, k1, k2, k3, k4, k5, k6, k7 = jax.random.split(key, 8)

    params = init_params(kp, feature_size, embedding_dim, hidden_dims)
    fused, vocabs = fold_params(params)

    cat_fea_sex = jax.random.randint(k1, (B,), 0, feature_size[0], jnp.int32)
    cat_fea_level_id = jax.random.randint(k2, (B,), 0, feature_size[1], jnp.int32)
    iter_fea_shop_id = jax.random.randint(k3, (B, L_SHOP), 0, feature_size[2] + 1, jnp.int32)
    iter_fea_cate = jax.random.randint(k4, (B, L_CATE), 0, feature_size[3] + 2, jnp.int32)
    iter_fea_floor = jax.random.randint(k5, (B, L_FLOOR), 0, feature_size[4] + 1, jnp.int32)
    candidate_shop_id = jax.random.randint(k6, (B,), 1, feature_size[2] + 1, jnp.int32)
    candidate_cate = jax.random.randint(k7, (B,), 1, feature_size[3] + 2, jnp.int32)

    cosine = dssm_forward(fused, cat_fea_sex, cat_fea_level_id, iter_fea_shop_id,
                          iter_fea_cate, iter_fea_floor, candidate_shop_id,
                          candidate_cate, vocabs=vocabs)
    cosine = jax.block_until_ready(cosine)

    ref = dssm_reference(params, cat_fea_sex, cat_fea_level_id, iter_fea_shop_id,
                         iter_fea_cate, iter_fea_floor, candidate_shop_id,
                         candidate_cate)

    assert cosine.shape == (B,)
    assert bool(jnp.all(jnp.isfinite(cosine)))
    # Deliberate bf16-multipass-aware tolerance: the kernel's f32 matmuls run
    # at default MXU precision (bf16 passes) while the reference uses
    # precision="highest"; this still catches any structural bug.
    assert bool(jnp.allclose(cosine, ref, atol=5e-2, rtol=0)), (cosine, ref)
    print("KERNEL_OK")
</pallas_src>

<mosaic_0001>
module attributes {stable_mosaic.version = 11 : i64} {
  func.func @dssm_kernel(%arg0: memref<8x13xi32, #tpu.memory_space<vmem>>, %arg1: memref<128x56xf32, #tpu.memory_space<vmem>>, %arg2: memref<56x16xf32, #tpu.memory_space<vmem>>, %arg3: memref<8x8xf32, #tpu.memory_space<vmem>>, %arg4: memref<8x8xf32, #tpu.memory_space<vmem>>, %arg5: memref<1x48xf32, #tpu.memory_space<vmem>>, %arg6: memref<1x8xf32, #tpu.memory_space<vmem>>) attributes {dimension_semantics = [], scalar_prefetch = 0 : i64, scratch_operands = 0 : i64, tpu.core_type = #tpu.core_type<tc>} {
    %c0 = arith.constant 0 : index
    %c0_0 = arith.constant 0 : index
    %0 = vector.load %arg0[%c0, %c0_0] : memref<8x13xi32, #tpu.memory_space<vmem>>, vector<8x13xi32>
    %1 = tpu.iota {dimensions = array<i32: 1>} : vector<8x128xi32>
    %2 = vector.extract_strided_slice %0 {offsets = [0, 0], sizes = [8, 1], strides = [1, 1]} : vector<8x13xi32> to vector<8x1xi32>
    %3 = vector.broadcast %2 : vector<8x1xi32> to vector<8x128xi32>
    %4 = arith.cmpi eq, %3, %1 : vector<8x128xi32>
    %5 = arith.extui %4 : vector<8x128xi1> to vector<8x128xi32>
    %6 = vector.extract_strided_slice %0 {offsets = [0, 1], sizes = [8, 1], strides = [1, 1]} : vector<8x13xi32> to vector<8x1xi32>
    %7 = vector.broadcast %6 : vector<8x1xi32> to vector<8x128xi32>
    %8 = arith.cmpi eq, %7, %1 : vector<8x128xi32>
    %9 = arith.extui %8 : vector<8x128xi1> to vector<8x128xi32>
    %10 = arith.addi %5, %9 : vector<8x128xi32>
    %11 = vector.extract_strided_slice %0 {offsets = [0, 2], sizes = [8, 1], strides = [1, 1]} : vector<8x13xi32> to vector<8x1xi32>
    %12 = vector.broadcast %11 : vector<8x1xi32> to vector<8x128xi32>
    %13 = arith.cmpi eq, %12, %1 : vector<8x128xi32>
    %14 = arith.extui %13 : vector<8x128xi1> to vector<8x128xi32>
    %15 = arith.addi %10, %14 : vector<8x128xi32>
    %16 = vector.extract_strided_slice %0 {offsets = [0, 3], sizes = [8, 1], strides = [1, 1]} : vector<8x13xi32> to vector<8x1xi32>
    %17 = vector.broadcast %16 : vector<8x1xi32> to vector<8x128xi32>
    %18 = arith.cmpi eq, %17, %1 : vector<8x128xi32>
    %19 = arith.extui %18 : vector<8x128xi1> to vector<8x128xi32>
    %20 = arith.addi %15, %19 : vector<8x128xi32>
    %21 = vector.extract_strided_slice %0 {offsets = [0, 4], sizes = [8, 1], strides = [1, 1]} : vector<8x13xi32> to vector<8x1xi32>
    %22 = vector.broadcast %21 : vector<8x1xi32> to vector<8x128xi32>
    %23 = arith.cmpi eq, %22, %1 : vector<8x128xi32>
    %24 = arith.extui %23 : vector<8x128xi1> to vector<8x128xi32>
    %25 = arith.addi %20, %24 : vector<8x128xi32>
    %26 = vector.extract_strided_slice %0 {offsets = [0, 5], sizes = [8, 1], strides = [1, 1]} : vector<8x13xi32> to vector<8x1xi32>
    %27 = vector.broadcast %26 : vector<8x1xi32> to vector<8x128xi32>
    %28 = arith.cmpi eq, %27, %1 : vector<8x128xi32>
    %29 = arith.extui %28 : vector<8x128xi1> to vector<8x128xi32>
    %30 = arith.addi %25, %29 : vector<8x128xi32>
    %31 = vector.extract_strided_slice %0 {offsets = [0, 6], sizes = [8, 1], strides = [1, 1]} : vector<8x13xi32> to vector<8x1xi32>
    %32 = vector.broadcast %31 : vector<8x1xi32> to vector<8x128xi32>
    %33 = arith.cmpi eq, %32, %1 : vector<8x128xi32>
    %34 = arith.extui %33 : vector<8x128xi1> to vector<8x128xi32>
    %35 = arith.addi %30, %34 : vector<8x128xi32>
    %36 = vector.extract_strided_slice %0 {offsets = [0, 7], sizes = [8, 1], strides = [1, 1]} : vector<8x13xi32> to vector<8x1xi32>
    %37 = vector.broadcast %36 : vector<8x1xi32> to vector<8x128xi32>
    %38 = arith.cmpi eq, %37, %1 : vector<8x128xi32>
    %39 = arith.extui %38 : vector<8x128xi1> to vector<8x128xi32>
    %40 = arith.addi %35, %39 : vector<8x128xi32>
    %41 = vector.extract_strided_slice %0 {offsets = [0, 8], sizes = [8, 1], strides = [1, 1]} : vector<8x13xi32> to vector<8x1xi32>
    %42 = vector.broadcast %41 : vector<8x1xi32> to vector<8x128xi32>
    %43 = arith.cmpi eq, %42, %1 : vector<8x128xi32>
    %44 = arith.extui %43 : vector<8x128xi1> to vector<8x128xi32>
    %45 = arith.addi %40, %44 : vector<8x128xi32>
    %46 = vector.extract_strided_slice %0 {offsets = [0, 9], sizes = [8, 1], strides = [1, 1]} : vector<8x13xi32> to vector<8x1xi32>
    %47 = vector.broadcast %46 : vector<8x1xi32> to vector<8x128xi32>
    %48 = arith.cmpi eq, %47, %1 : vector<8x128xi32>
    %49 = arith.extui %48 : vector<8x128xi1> to vector<8x128xi32>
    %50 = arith.addi %45, %49 : vector<8x128xi32>
    %51 = vector.extract_strided_slice %0 {offsets = [0, 10], sizes = [8, 1], strides = [1, 1]} : vector<8x13xi32> to vector<8x1xi32>
    %52 = vector.broadcast %51 : vector<8x1xi32> to vector<8x128xi32>
    %53 = arith.cmpi eq, %52, %1 : vector<8x128xi32>
    %54 = arith.extui %53 : vector<8x128xi1> to vector<8x128xi32>
    %55 = arith.addi %50, %54 : vector<8x128xi32>
    %56 = vector.extract_strided_slice %0 {offsets = [0, 11], sizes = [8, 1], strides = [1, 1]} : vector<8x13xi32> to vector<8x1xi32>
    %57 = vector.broadcast %56 : vector<8x1xi32> to vector<8x128xi32>
    %58 = arith.cmpi eq, %57, %1 : vector<8x128xi32>
    %59 = arith.extui %58 : vector<8x128xi1> to vector<8x128xi32>
    %60 = arith.addi %55, %59 : vector<8x128xi32>
    %61 = vector.extract_strided_slice %0 {offsets = [0, 12], sizes = [8, 1], strides = [1, 1]} : vector<8x13xi32> to vector<8x1xi32>
    %62 = vector.broadcast %61 : vector<8x1xi32> to vector<8x128xi32>
    %63 = arith.cmpi eq, %62, %1 : vector<8x128xi32>
    %64 = arith.extui %63 : vector<8x128xi1> to vector<8x128xi32>
    %65 = arith.addi %60, %64 : vector<8x128xi32>
    %66 = arith.sitofp %65 : vector<8x128xi32> to vector<8x128xf32>
    %c0_1 = arith.constant 0 : index
    %c0_2 = arith.constant 0 : index
    %67 = vector.load %arg1[%c0_1, %c0_2] : memref<128x56xf32, #tpu.memory_space<vmem>>, vector<128x56xf32>
    %cst = arith.constant dense<0.000000e+00> : vector<8x56xf32>
    %68 = tpu.matmul %66, %67, %cst {dimension_numbers = #tpu.dot_dimension_numbers<[1], [0], [0], [1], [0, 0, 1, 1], [], []>} : vector<8x128xf32>, vector<128x56xf32>, vector<8x56xf32> -> vector<8x56xf32>
    %c0_3 = arith.constant 0 : index
    %c0_4 = arith.constant 0 : index
    %69 = vector.load %arg5[%c0_3, %c0_4] : memref<1x48xf32, #tpu.memory_space<vmem>>, vector<1x48xf32>
    %70 = vector.extract_strided_slice %69 {offsets = [0, 0], sizes = [1, 16], strides = [1, 1]} : vector<1x48xf32> to vector<1x16xf32>
    %71 = vector.extract_strided_slice %69 {offsets = [0, 16], sizes = [1, 8], strides = [1, 1]} : vector<1x48xf32> to vector<1x8xf32>
    %72 = vector.extract_strided_slice %69 {offsets = [0, 24], sizes = [1, 8], strides = [1, 1]} : vector<1x48xf32> to vector<1x8xf32>
    %73 = vector.extract_strided_slice %69 {offsets = [0, 32], sizes = [1, 8], strides = [1, 1]} : vector<1x48xf32> to vector<1x8xf32>
    %74 = vector.extract_strided_slice %69 {offsets = [0, 40], sizes = [1, 8], strides = [1, 1]} : vector<1x48xf32> to vector<1x8xf32>
    %c0_5 = arith.constant 0 : index
    %c0_6 = arith.constant 0 : index
    %75 = vector.load %arg2[%c0_5, %c0_6] : memref<56x16xf32, #tpu.memory_space<vmem>>, vector<56x16xf32>
    %cst_7 = arith.constant dense<0.000000e+00> : vector<8x16xf32>
    %76 = tpu.matmul %68, %75, %cst_7 {dimension_numbers = #tpu.dot_dimension_numbers<[1], [0], [0], [1], [0, 0, 1, 1], [], []>} : vector<8x56xf32>, vector<56x16xf32>, vector<8x16xf32> -> vector<8x16xf32>
    %77 = vector.broadcast %70 : vector<1x16xf32> to vector<8x16xf32>
    %78 = arith.addf %76, %77 : vector<8x16xf32>
    %79 = math.tanh %78 : vector<8x16xf32>
    %80 = vector.extract_strided_slice %79 {offsets = [0, 0], sizes = [8, 8], strides = [1, 1]} : vector<8x16xf32> to vector<8x8xf32>
    %cst_8 = arith.constant dense<0.000000e+00> : vector<8xf32>
    %81 = vector.multi_reduction <add>, %80, %cst_8 [0] : vector<8x8xf32> to vector<8xf32>
    %82 = vector.shape_cast %81 : vector<8xf32> to vector<1x8xf32>
    %cst_9 = arith.constant 8.000000e+00 : f32
    %83 = vector.broadcast %cst_9 : f32 to vector<1x8xf32>
    %84 = arith.divf %82, %83 : vector<1x8xf32>
    %85 = vector.broadcast %84 : vector<1x8xf32> to vector<8x8xf32>
    %86 = arith.subf %80, %85 : vector<8x8xf32>
    %87 = vector.broadcast %84 : vector<1x8xf32> to vector<8x8xf32>
    %88 = arith.subf %80, %87 : vector<8x8xf32>
    %89 = arith.mulf %86, %88 : vector<8x8xf32>
    %cst_10 = arith.constant dense<0.000000e+00> : vector<8xf32>
    %90 = vector.multi_reduction <add>, %89, %cst_10 [0] : vector<8x8xf32> to vector<8xf32>
    %91 = vector.shape_cast %90 : vector<8xf32> to vector<1x8xf32>
    %cst_11 = arith.constant 8.000000e+00 : f32
    %92 = vector.broadcast %cst_11 : f32 to vector<1x8xf32>
    %93 = arith.divf %91, %92 : vector<1x8xf32>
    %94 = vector.broadcast %84 : vector<1x8xf32> to vector<8x8xf32>
    %95 = arith.subf %80, %94 : vector<8x8xf32>
    %cst_12 = arith.constant 9.99999974E-6 : f32
    %96 = vector.broadcast %cst_12 : f32 to vector<1x8xf32>
    %97 = arith.addf %93, %96 : vector<1x8xf32>
    %98 = math.rsqrt %97 : vector<1x8xf32>
    %99 = vector.broadcast %98 : vector<1x8xf32> to vector<8x8xf32>
    %100 = arith.mulf %95, %99 : vector<8x8xf32>
    %101 = vector.broadcast %73 : vector<1x8xf32> to vector<8x8xf32>
    %102 = arith.mulf %100, %101 : vector<8x8xf32>
    %103 = vector.broadcast %74 : vector<1x8xf32> to vector<8x8xf32>
    %104 = arith.addf %102, %103 : vector<8x8xf32>
    %105 = vector.extract_strided_slice %79 {offsets = [0, 8], sizes = [8, 8], strides = [1, 1]} : vector<8x16xf32> to vector<8x8xf32>
    %106 = tpu.concatenate %104, %105 in 0 : vector<8x8xf32>, vector<8x8xf32> -> vector<16x8xf32>
    %c0_13 = arith.constant 0 : index
    %c0_14 = arith.constant 0 : index
    %107 = vector.load %arg3[%c0_13, %c0_14] : memref<8x8xf32, #tpu.memory_space<vmem>>, vector<8x8xf32>
    %cst_15 = arith.constant dense<0.000000e+00> : vector<16x8xf32>
    %108 = tpu.matmul %106, %107, %cst_15 {dimension_numbers = #tpu.dot_dimension_numbers<[1], [0], [0], [1], [0, 0, 1, 1], [], []>} : vector<16x8xf32>, vector<8x8xf32>, vector<16x8xf32> -> vector<16x8xf32>
    %109 = vector.broadcast %71 : vector<1x8xf32> to vector<16x8xf32>
    %110 = arith.addf %108, %109 : vector<16x8xf32>
    %111 = math.tanh %110 : vector<16x8xf32>
    %112 = vector.extract_strided_slice %111 {offsets = [0, 0], sizes = [8, 8], strides = [1, 1]} : vector<16x8xf32> to vector<8x8xf32>
    %cst_16 = arith.constant dense<0.000000e+00> : vector<8xf32>
    %113 = vector.multi_reduction <add>, %112, %cst_16 [0] : vector<8x8xf32> to vector<8xf32>
    %114 = vector.shape_cast %113 : vector<8xf32> to vector<1x8xf32>
    %cst_17 = arith.constant 8.000000e+00 : f32
    %115 = vector.broadcast %cst_17 : f32 to vector<1x8xf32>
    %116 = arith.divf %114, %115 : vector<1x8xf32>
    %117 = vector.broadcast %116 : vector<1x8xf32> to vector<8x8xf32>
    %118 = arith.subf %112, %117 : vector<8x8xf32>
    %119 = vector.broadcast %116 : vector<1x8xf32> to vector<8x8xf32>
    %120 = arith.subf %112, %119 : vector<8x8xf32>
    %121 = arith.mulf %118, %120 : vector<8x8xf32>
    %cst_18 = arith.constant dense<0.000000e+00> : vector<8xf32>
    %122 = vector.multi_reduction <add>, %121, %cst_18 [0] : vector<8x8xf32> to vector<8xf32>
    %123 = vector.shape_cast %122 : vector<8xf32> to vector<1x8xf32>
    %cst_19 = arith.constant 8.000000e+00 : f32
    %124 = vector.broadcast %cst_19 : f32 to vector<1x8xf32>
    %125 = arith.divf %123, %124 : vector<1x8xf32>
    %126 = vector.broadcast %116 : vector<1x8xf32> to vector<8x8xf32>
    %127 = arith.subf %112, %126 : vector<8x8xf32>
    %cst_20 = arith.constant 9.99999974E-6 : f32
    %128 = vector.broadcast %cst_20 : f32 to vector<1x8xf32>
    %129 = arith.addf %125, %128 : vector<1x8xf32>
    %130 = math.rsqrt %129 : vector<1x8xf32>
    %131 = vector.broadcast %130 : vector<1x8xf32> to vector<8x8xf32>
    %132 = arith.mulf %127, %131 : vector<8x8xf32>
    %133 = vector.broadcast %73 : vector<1x8xf32> to vector<8x8xf32>
    %134 = arith.mulf %132, %133 : vector<8x8xf32>
    %135 = vector.broadcast %74 : vector<1x8xf32> to vector<8x8xf32>
    %136 = arith.addf %134, %135 : vector<8x8xf32>
    %137 = vector.extract_strided_slice %111 {offsets = [8, 0], sizes = [8, 8], strides = [1, 1]} : vector<16x8xf32> to vector<8x8xf32>
    %138 = tpu.concatenate %136, %137 in 0 : vector<8x8xf32>, vector<8x8xf32> -> vector<16x8xf32>
    %c0_21 = arith.constant 0 : index
    %c0_22 = arith.constant 0 : index
    %139 = vector.load %arg4[%c0_21, %c0_22] : memref<8x8xf32, #tpu.memory_space<vmem>>, vector<8x8xf32>
    %cst_23 = arith.constant dense<0.000000e+00> : vector<16x8xf32>
    %140 = tpu.matmul %138, %139, %cst_23 {dimension_numbers = #tpu.dot_dimension_numbers<[1], [0], [0], [1], [0, 0, 1, 1], [], []>} : vector<16x8xf32>, vector<8x8xf32>, vector<16x8xf32> -> vector<16x8xf32>
    %141 = vector.broadcast %72 : vector<1x8xf32> to vector<16x8xf32>
    %142 = arith.addf %140, %141 : vector<16x8xf32>
    %143 = math.tanh %142 : vector<16x8xf32>
    %144 = vector.extract_strided_slice %143 {offsets = [0, 0], sizes = [8, 8], strides = [1, 1]} : vector<16x8xf32> to vector<8x8xf32>
    %145 = vector.extract_strided_slice %143 {offsets = [8, 0], sizes = [8, 8], strides = [1, 1]} : vector<16x8xf32> to vector<8x8xf32>
    %146 = arith.mulf %144, %145 : vector<8x8xf32>
    %147 = arith.mulf %144, %144 : vector<8x8xf32>
    %148 = arith.mulf %145, %145 : vector<8x8xf32>
    %149 = tpu.concatenate %146, %147, %148 in 0 : vector<8x8xf32>, vector<8x8xf32>, vector<8x8xf32> -> vector<24x8xf32>
    %cst_24 = arith.constant 1.000000e+00 : f32
    %150 = vector.broadcast %cst_24 : f32 to vector<8x8xf32>
    %cst_25 = arith.constant dense<0.000000e+00> : vector<8x24xf32>
    %151 = tpu.matmul %150, %149, %cst_25 {dimension_numbers = #tpu.dot_dimension_numbers<[1], [1], [0], [0], [0, 0, 1, 0], [], []>} : vector<8x8xf32>, vector<24x8xf32>, vector<8x24xf32> -> vector<8x24xf32>
    %152 = vector.extract_strided_slice %151 {offsets = [0, 0], sizes = [1, 24], strides = [1, 1]} : vector<8x24xf32> to vector<1x24xf32>
    %153 = vector.extract_strided_slice %152 {offsets = [0, 0], sizes = [1, 8], strides = [1, 1]} : vector<1x24xf32> to vector<1x8xf32>
    %154 = vector.extract_strided_slice %152 {offsets = [0, 8], sizes = [1, 8], strides = [1, 1]} : vector<1x24xf32> to vector<1x8xf32>
    %155 = vector.extract_strided_slice %152 {offsets = [0, 16], sizes = [1, 8], strides = [1, 1]} : vector<1x24xf32> to vector<1x8xf32>
    %156 = arith.mulf %154, %155 : vector<1x8xf32>
    %cst_26 = arith.constant 1.000000e-16 : f32
    %157 = vector.broadcast %cst_26 : f32 to vector<1x8xf32>
    %158 = arith.maximumf %156, %157 : vector<1x8xf32>
    %159 = math.rsqrt %158 : vector<1x8xf32>
    %160 = arith.mulf %153, %159 : vector<1x8xf32>
    %c0_27 = arith.constant 0 : index
    %c0_28 = arith.constant 0 : index
    %161 = vector.load %arg6[%c0_27, %c0_28] : memref<1x8xf32, #tpu.memory_space<vmem>>, vector<1x8xf32>
    tpu.vector_store %arg6[%c0_27, %c0_28], %160 {strides = array<i32>} : memref<1x8xf32, #tpu.memory_space<vmem>>, vector<1x8xf32>,
    return
  }
}

</mosaic_0001>

<bundles_post_ra>
// kernel: dssm_forward.1
= control target key start
LH: loop header
LB: loop body
LE: loop exit
PB: predicated region body
PF: predicated region fallthrough
CT: control target
= control target key end

     0   :  { %v853_v1 = vmov 2   ;;  %v854_v2 = vmov 0   ;;  %s1068_s0 = inlined_call_operand.vmem [shape: s32[8,13], index: 0, kind: input, shape index: {}]   ;;  %s1069_s1 = inlined_call_operand.vmem [shape: f32[128,56], index: 1, kind: input, shape index: {}]   ;;  %s1070_s2 = inlined_call_operand.vmem [shape: f32[56,16], index: 2, kind: input, shape index: {}]   ;;  %s1071_s3 = inlined_call_operand.vmem [shape: f32[8,8], index: 3, kind: input, shape index: {}]   ;;  %s1072_s4 = inlined_call_operand.vmem [shape: f32[8,8], index: 4, kind: input, shape index: {}]   ;;  %s1073_s5 = inlined_call_operand.vmem [shape: f32[1,48], index: 5, kind: input, shape index: {}]   ;;  %s1074_s6 = inlined_call_operand.hbm [shape: f32[1,8], index: 6, kind: output, shape index: {}]  }
   0x1   :  { %v914_v0 = vld [vmem:[%s1068_s0] sm:$0xff]  ;;  %801 = vset.pattern.permute.xlu1 %v853_v1  ;;  %799 = vset.pattern.permute.xlu0 %v854_v2 }
   0x2   :  { %11 = vsyncpa [#allocation3], 0  ;;  %39 = vperm.xlu1 %801, %v914_v0   ;;  %28 = vperm.xlu0 %799, %v914_v0   ;;  %v855_v3 = vmov 3   ;;  %v856_v4 = vmov 1   ;;  %v105_v5 = vld [vmem:[%s1069_s1] sm:$0xff]  ;;  %v106_v6 = vld [vmem:[%s1069_s1 + $0x8] sm:$0xff]  ;;  %v25_v49 = vlaneseq }
   0x3   :  { %v740_v7 = vpack.c.bf16 %v106_v6, %v105_v5  ;;  %v857_v8 = vmov 4   ;;  %v858_v9 = vmov 5   ;;  %v859_v10 = vmov 0.0|0.0   ;;  %v107_v11 = vld [vmem:[%s1069_s1 + $0x10] sm:$0xff]  ;;  %v108_v12 = vld [vmem:[%s1069_s1 + $0x18] sm:$0xff]  ;;  %v109_v16 = vld [vmem:[%s1069_s1 + $0x20] sm:$0xff] }
   0x4   :  { %739 = vmatprep.subr.bf16.mxu0 %v859_v10  ;;  %763 = vmatprep.subr.bf16.mxu1 %v859_v10  ;;  %v743_v13 = vpack.c.bf16 %v108_v12, %v107_v11  ;;  %v860_v14 = vmov 6   ;;  %v861_v15 = vmov 8   ;;  %v110_v17 = vld [vmem:[%s1069_s1 + $0x28] sm:$0xff]  ;;  %v862_v19 = vmov 7   ;;  %v111_v21 = vld [vmem:[%s1069_s1 + $0x30] sm:$0xff]  ;;  %v112_v22 = vld [vmem:[%s1069_s1 + $0x38] sm:$0xff] }
   0x5   :  { %741 = vmatpush3.bf16.msra.mxu0 %v740_v7  ;;  %v746_v18 = vpack.c.bf16 %v110_v17, %v109_v16  ;;  %v863_v20 = vmov 11   ;;  %v749_v23 = vpack.c.bf16 %v112_v22, %v111_v21  ;;  %v113_v24 = vld [vmem:[%s1069_s1 + $0x40] sm:$0xff]  ;;  %v114_v25 = vld [vmem:[%s1069_s1 + $0x48] sm:$0xff]  ;;  %v864_v26 = vmov 9   ;;  %v115_v29 = vld [vmem:[%s1069_s1 + $0x50] sm:$0xff]  ;;  %s869_s20 = smov 96  }
   0x6   :  { %802 = vset.pattern.permute.xlu1 %v855_v3  ;;  %800 = vset.pattern.permute.xlu0 %v856_v4  ;;  %v865_v27 = vmov 12   ;;  %v752_v28 = vpack.c.bf16 %v114_v25, %v113_v24  ;;  %v116_v30 = vld [vmem:[%s1069_s1 + $0x58] sm:$0xff]  ;;  %v866_v31 = vmov 10   ;;  %v117_v33 = vld [vmem:[%s1069_s1 + $0x60] sm:$0xff]  ;;  %v118_v34 = vld [vmem:[%s1069_s1 + $0x68] sm:$0xff]  ;;  %vm867_vm0 = vmmov 0  }
   0x7   :  { %45 = vperm.xlu1 %802, %v914_v0   ;;  %33 = vperm.xlu0 %800, %v914_v0   ;;  %v755_v32 = vpack.c.bf16 %v116_v30, %v115_v29  ;;  %v758_v35 = vpack.c.bf16 %v118_v34, %v117_v33  ;;  %v119_v36 = vld [vmem:[%s1069_s1 + $0x70] sm:$0xff]  ;;  %v120_v37 = vld [vmem:[%s1069_s1 + $0x78] sm:$0xff]  ;;  %v868_v39 = vmov 0.0   ;;  %v192_v40 = vld [vmem:[%s1070_s2] sm:$0xff]  ;;  %v26_v50 = vand.u32 127, %v25_v49  ;;  %s870_s21 = smov 88  }
   0x8   :  { %742 = vmatprep.subr.bf16.mxu0 %v859_v10  ;;  %v761_v38 = vpack.c.bf16 %v120_v37, %v119_v36  ;;  %700 = vmatprep.mubr.msk.f32.mxu0 %vm867_vm0, %v868_v39  ;;  %v193_v41 = vld [vmem:[%s1070_s2 + $0x8] sm:$0xff]  ;;  %v194_v42 = vld [vmem:[%s1070_s2 + $0x10] sm:$0xff]  ;;  %v195_v44 = vld [vmem:[%s1070_s2 + $0x18] sm:$0xff]  ;;  %vm205_vm14 = vcmask 457728   ;;  %vm280_vm15 = vcmask 64512   ;;  %s873_s24 = smov 104  }
   0x9   :  { %744 = vmatpush3.bf16.msra.mxu0 %v743_v13  ;;  %717 = vmatprep.mubr.msk.f32.mxu1 %vm867_vm0, %v868_v39  ;;  %v764_v43 = vpack.c.bf16 %v193_v41, %v192_v40  ;;  %v767_v45 = vpack.c.bf16 %v195_v44, %v194_v42  ;;  %v196_v46 = vld [vmem:[%s1070_s2 + $0x20] sm:$0xff]  ;;  %v197_v47 = vld [vmem:[%s1070_s2 + $0x28] sm:$0xff] }
   0xa   :  { %745 = vmatprep.subr.bf16.mxu0 %v859_v10  ;;  %v770_v48 = vpack.c.bf16 %v197_v47, %v196_v46  ;;  %v623_v29 = vld [vmem:[%s1073_s5] ss:$0 sm:$0xff]  ;;  %s872_s5 = smov 120  }
   0xb   :  { %803 = vset.pattern.permute.xlu1 %v857_v8  ;;  %804 = vset.pattern.permute.xlu0 %v858_v9 }
   0xc   :  { %51 = vperm.xlu1 %803, %v914_v0   ;;  %57 = vperm.xlu0 %804, %v914_v0  }
   0xd   :  { %747 = vmatpush3.bf16.msra.mxu0 %v746_v18  ;;  %765 = vmatpush3.bf16.msra.mxu1 %v764_v43 }
   0xe   :  { %748 = vmatprep.subr.bf16.mxu0 %v859_v10  ;;  %766 = vmatprep.subr.bf16.mxu1 %v859_v10 }
  0x10   :  { %805 = vset.pattern.permute.xlu1 %v860_v14  ;;  %807 = vset.pattern.permute.xlu0 %v861_v15 }
  0x11   :  { %63 = vperm.xlu1 %805, %v914_v0   ;;  %75 = vperm.xlu0 %807, %v914_v0  }
  0x12   :  { %750 = vmatpush3.bf16.msra.mxu0 %v749_v23  ;;  %768 = vmatpush3.bf16.msra.mxu1 %v767_v45 }
  0x13   :  { %751 = vmatprep.subr.bf16.mxu0 %v859_v10  ;;  %769 = vmatprep.subr.bf16.mxu1 %v859_v10 }
  0x15   :  { %806 = vset.pattern.permute.xlu1 %v862_v19  ;;  %810 = vset.pattern.permute.xlu0 %v863_v20 }
  0x16   :  { %69 = vperm.xlu1 %806, %v914_v0   ;;  %93 = vperm.xlu0 %810, %v914_v0  }
  0x17   :  { %753 = vmatpush3.bf16.msra.mxu0 %v752_v28  ;;  %771 = vmatpush3.bf16.msra.mxu1 %v770_v48  ;;  %v198_v28 = vld [vmem:[%s1070_s2 + $0x30] sm:$0xff]  ;;  %s871_s2 = smov 112  }
  0x18   :  { %754 = vmatprep.subr.bf16.mxu0 %v859_v10  ;;  %715 = vmatprep.subr.mxu1 %v868_v39 }
  0x1a   :  { %808 = vset.pattern.permute.xlu1 %v864_v26  ;;  %812 = vset.pattern.permute.xlu0 %v865_v27 }
  0x1b   :  { %81 = vperm.xlu1 %808, %v914_v0   ;;  %756 = vmatpush3.bf16.msra.mxu0 %v755_v32 }
  0x1c   :  { %757 = vmatprep.subr.bf16.mxu0 %v859_v10  ;;  %716 = vmatpush3.msra.mxu1 %v198_v28 }
  0x1d   :  { %307 = vrot.lane.b32.xlu0 %v623_v29, %s870_s21 }
  0x1f   :  { %809 = vset.pattern.permute.xlu1 %v866_v31  ;;  %759 = vmatpush3.bf16.msra.mxu0 %v758_v35 }
  0x20   :  { %87 = vperm.xlu1 %809, %v914_v0   ;;  %760 = vmatprep.subr.bf16.mxu0 %v859_v10 }
  0x21   :  { %315 = vrot.lane.b32.xlu0 %v623_v29, %s871_s2 }
  0x23   :  { %762 = vmatpush3.bf16.msra.mxu0 %v761_v38 }
  0x24   :  { %811 = vset.pattern.permute.xlu1 %v865_v27 }
  0x25   :  { %99 = vperm.xlu1 %811, %v914_v0  }
  0x29   :  { %303 = vrot.lane.b32.xlu1 %v623_v29, %s869_s20 }
  0x81   :  { %v40_v51 = vpop.permute.xlu1 %39  ;;  %v29_v52 = vpop.permute.xlu0 %28 }
  0x82   :  { %vm30_vm1 = vcmp.eq.s32.totalorder %v29_v52, %v26_v50  ;;  %vm41_vm2 = vcmp.eq.s32.totalorder %v40_v51, %v26_v50 }
  0x83   :  { %v31_v53 = vsel %vm30_vm1, 1, %v854_v2  ;;  %v42_v58 = vsel %vm41_vm2, 1, %v854_v2  ;;  %vm774_vm1 = vmpackc.low %vm280_vm15, %vm280_vm15 }
  0x86   :  { %v46_v54 = vpop.permute.xlu1 %45  ;;  %v34_v55 = vpop.permute.xlu0 %33 }
  0x87   :  { %vm35_vm3 = vcmp.eq.s32.totalorder %v34_v55, %v26_v50  ;;  %vm47_vm4 = vcmp.eq.s32.totalorder %v46_v54, %v26_v50 }
  0x88   :  { %v36_v56 = vsel %vm35_vm3, 1, %v854_v2  ;;  %v48_v62 = vsel %vm47_vm4, 1, %v854_v2 }
  0x89   :  { %v37_v57 = vadd.s32 %v36_v56, %v31_v53 }
  0x8b   :  { %v43_v59 = vadd.s32 %v42_v58, %v37_v57  ;;  %v52_v60 = vpop.permute.xlu1 %51  ;;  %v58_v61 = vpop.permute.xlu0 %57 }
  0x8c   :  { %vm53_vm5 = vcmp.eq.s32.totalorder %v52_v60, %v26_v50  ;;  %vm59_vm6 = vcmp.eq.s32.totalorder %v58_v61, %v26_v50 }
  0x8d   :  { %v49_v63 = vadd.s32 %v48_v62, %v43_v59  ;;  %v54_v0 = vsel %vm53_vm5, 1, %v854_v2  ;;  %v60_v3 = vsel %vm59_vm6, 1, %v854_v2 }
  0x8f   :  { %v55_v1 = vadd.s32 %v54_v0, %v49_v63  ;;  %v423_v63 = vld [vmem:[%s1072_s4] sm:$0xff]  ;;  %s875_s4 = smov [#allocation2]  }
  0x90   :  { %v64_v4 = vpop.permute.xlu1 %63  ;;  %v76_v7 = vpop.permute.xlu0 %75  ;;  %s615_s25 = sshll.u32 %s875_s4, 4  ;;  %s616_s25 = int_to_ptr.vmem [resolvable:$true] %s615_s25 }
  0x91   :  { %vm65_vm7 = vcmp.eq.s32.totalorder %v64_v4, %v26_v50  ;;  %v61_v5 = vadd.s32 %v60_v3, %v55_v1  ;;  %vm77_vm9 = vcmp.eq.s32.totalorder %v76_v7, %v26_v50  ;;  %s829_s26 = scalar_lea.vmem %s616_s25, 16  ;;  %s833_s27 = scalar_lea.vmem %s616_s25, 32 }
  0x92   :  { %v66_v6 = vsel %vm65_vm7, 1, %v854_v2  ;;  %v78_v13 = vsel %vm77_vm9, 1, %v854_v2  ;;  %p830_p0 = scmp.ne.s32.totalorder %s616_s25, %s829_s26  ;;  %p834_p1 = scmp.lt.s32.totalorder %s616_s25, %s616_s25 }
  0x93   :  { %v67_v9 = vadd.s32 %v66_v6, %v61_v5  ;;  %p835_p2 = scmp.lt.s32.totalorder %s833_s27, %s829_s26 }
  0x95   :  { %v70_v8 = vpop.permute.xlu1 %69  ;;  %v94_v15 = vpop.permute.xlu0 %93  ;;  %p836_p3 = por %p835_p2, %p834_p1 }
  0x96   :  { %vm71_vm8 = vcmp.eq.s32.totalorder %v70_v8, %v26_v50  ;;  %vm95_vm11 = vcmp.eq.s32.totalorder %v94_v15, %v26_v50 }
  0x97   :  { %v72_v11 = vsel %vm71_vm8, 1, %v854_v2  ;;  %v96_v21 = vsel %vm95_vm11, 1, %v854_v2  ;;  %p837_p4 = pnand %p836_p3, %p830_p0 }
  0x98   :  { %v73_v12 = vadd.s32 %v72_v11, %v67_v9 }
  0x99   :  { %v308_v59 = vpop.permute.xlu0 %307 }
  0x9a   :  { %v82_v14 = vpop.permute.xlu1 %81  ;;  %v79_v16 = vadd.s32 %v78_v13, %v73_v12 }
  0x9b   :  { %vm83_vm10 = vcmp.eq.s32.totalorder %v82_v14, %v26_v50 }
  0x9c   :  { %v84_v17 = vsel %vm83_vm10, 1, %v854_v2 }
  0x9d   :  { %v85_v19 = vadd.s32 %v84_v17, %v79_v16  ;;  %v316_v0 = vpop.permute.xlu0 %315 }
  0x9f   :  { %v88_v18 = vpop.permute.xlu1 %87 }
  0xa0   :  { %vm89_vm12 = vcmp.eq.s32.totalorder %v88_v18, %v26_v50 }
  0xa1   :  { %v90_v20 = vsel %vm89_vm12, 1, %v854_v2 }
  0xa2   :  { %v91_v22 = vadd.s32 %v90_v20, %v85_v19 }
  0xa4   :  { %v97_v23 = vadd.s32 %v96_v21, %v91_v22  ;;  %v100_v24 = vpop.permute.xlu1 %99 }
  0xa5   :  { %vm101_vm13 = vcmp.eq.s32.totalorder %v100_v24, %v26_v50 }
  0xa6   :  { %v102_v25 = vsel %vm101_vm13, 1, %v854_v2  ;;  %v314_v2 = vld [vmem:[%s1071_s3] sm:$0xff] }
  0xa7   :  { %v103_v26 = vadd.s32 %v102_v25, %v97_v23  ;;  %720 = vmatprep.subr.mxu1 %v314_v2 }
  0xa8   :  { %v304_v57 = vpop.permute.xlu1 %303 }
  0xa9   :  { %v104_v27 = vcvt.s32.f32 %v103_v26 }
  0xab   :  { %701 = vmatmul.mubr.f32.vlgmr.msra.gmra.mrb[0].mxu0 %v104_v27 }
 0x17e   :  { %v187_v30 = vpop.f32.mrb[0].mxu0 }
 0x17f   :  { %v702_v31 = vpop.f32.mrb[1].mxu0  ;;  %718 = vmatmul.mubr.msk.f32.vlgmr.msra.gmra.mrb[0].mxu1 %vm205_vm14, %v187_v30 }
 0x180   :  { %721 = vmatpush3.msra.mxu1 %v314_v2 }
 0x181   :  { %725 = vmatprep.subr.mxu1 %v423_v63 }
 0x252   :  { %v275_v32 = vpop.f32.mrb[0].mxu1 }
 0x253   :  { %v276_v33 = vadd.f32 %v623_v29, %v275_v32  ;;  %v719_v34 = vpop.f32.mrb[1].mxu1 }
 0x255   :  { %813 = vtanh.f32 %v276_v33 }
 0x25f   :  { %v814_v35 = vpop.eup %813 }
 0x260   :  { %312 = vrot.lane.b32.xlu1 %v814_v35, %s872_s5  ;;  %v281_v36 = vsel %vm280_vm15, %v814_v35, 0.0 }
 0x261   :  { %v282_v37 = vrot.slane %v281_v36, 4 }
 0x263   :  { %v283_v38 = vadd.f32 %v282_v37, %v281_v36 }
 0x264   :  { %424 = vrot.lane.b32.xlu1 %v623_v29, %s873_s24 }
 0x265   :  { %v284_v40 = vrot.slane %v283_v38, 2 }
 0x267   :  { %v285_v41 = vadd.f32 %v284_v40, %v283_v38 }
 0x269   :  { %v286_v42 = vrot.slane %v285_v41, 1 }
 0x26b   :  { %v287_v43 = vadd.f32 %v286_v42, %v285_v41  ;;  %v874_v42 = vmov 1.0  }
 0x26d   :  { %v289_v44 = vmul.f32 0.125, %v287_v43 }
 0x26f   :  { %v290_v45 = vsub.f32 %v814_v35, %v289_v44 }
 0x271   :  { %v291_v46 = vmul.f32 %v290_v45, %v290_v45 }
 0x273   :  { %v292_v47 = vsel %vm280_vm15, %v291_v46, 0.0 }
 0x274   :  { %v293_v48 = vrot.slane %v292_v47, 4 }
 0x276   :  { %v294_v49 = vadd.f32 %v293_v48, %v292_v47 }
 0x278   :  { %v295_v50 = vrot.slane %v294_v49, 2 }
 0x27a   :  { %v296_v51 = vadd.f32 %v295_v50, %v294_v49 }
 0x27c   :  { %v297_v52 = vrot.slane %v296_v51, 1 }
 0x27e   :  { %v298_v53 = vadd.f32 %v297_v52, %v296_v51 }
 0x280   :  { %v299_v54 = vmul.f32 0.125, %v298_v53 }
 0x282   :  { %v300_v55 = vadd.f32 1e-05, %v299_v54 }
 0x284   :  { %815 = vrsqrt.f32 %v300_v55 }
 0x28e   :  { %v816_v56 = vpop.eup %815 }
 0x28f   :  { %v302_v58 = vmul.f32 %v816_v56, %v290_v45 }
 0x291   :  { %v306_v60 = vmul.f32 %v304_v57, %v302_v58 }
 0x293   :  { %v310_v61 = vadd.f32 %v308_v59, %v306_v60 }
 0x295   :  { %722 = vmatprep.mubr.msk.f32.mxu1 %vm280_vm15, %v310_v61 }
 0x2d2   :  { %v313_v62 = vpop.permute.xlu1 %312 }
 0x2d3   :  { %723 = vmatmul.mubr.msk.f32.vlgmr.msra.gmra.mrb[2].mxu1 %vm280_vm15, %v313_v62 }
 0x2d4   :  { %726 = vmatpush3.msra.mxu1 %v423_v63 }
 0x2d5   :  { %772 = vmatprep.subr.bf16.mxu1 %v859_v10 }
 0x2d6   :  { %v425_v31 = vpop.permute.xlu1 %424 }
 0x3a6   :  { %v724_v1 = vpop.f32.mrb[2].mxu1 }
 0x3a7   :  { %v389_v3 = vpop.f32.mrb[3].mxu1  ;;  %v395_v25 = vadd.f32 %v724_v1, %v316_v0 }
 0x3a8   :  { %v390_v4 = vadd.f32 %v389_v3, %v316_v0 }
 0x3aa   :  { %817 = vtanh.f32 %v390_v4 }
 0x3b4   :  { %v818_v5 = vpop.eup %817 }
 0x3b5   :  { %v400_v6 = vsel %vm280_vm15, %v818_v5, 0.0 }
 0x3b6   :  { %v401_v7 = vrot.slane %v400_v6, 4 }
 0x3b8   :  { %v402_v8 = vadd.f32 %v401_v7, %v400_v6 }
 0x3ba   :  { %v403_v9 = vrot.slane %v402_v8, 2 }
 0x3bc   :  { %v404_v11 = vadd.f32 %v403_v9, %v402_v8 }
 0x3be   :  { %v405_v12 = vrot.slane %v404_v11, 1 }
 0x3c0   :  { %v406_v13 = vadd.f32 %v405_v12, %v404_v11 }
 0x3c2   :  { %v407_v14 = vmul.f32 0.125, %v406_v13 }
 0x3c4   :  { %v408_v15 = vsub.f32 %v818_v5, %v407_v14 }
 0x3c6   :  { %v409_v16 = vmul.f32 %v408_v15, %v408_v15 }
 0x3c8   :  { %v410_v10 = vsel %vm280_vm15, %v409_v16, 0.0 }
 0x3c9   :  { %v411_v17 = vrot.slane %v410_v10, 4 }
 0x3cb   :  { %v412_v18 = vadd.f32 %v411_v17, %v410_v10 }
 0x3cd   :  { %v413_v19 = vrot.slane %v412_v18, 2 }
 0x3cf   :  { %v414_v20 = vadd.f32 %v413_v19, %v412_v18 }
 0x3d1   :  { %v415_v21 = vrot.slane %v414_v20, 1 }
 0x3d3   :  { %v416_v22 = vadd.f32 %v415_v21, %v414_v20 }
 0x3d5   :  { %v417_v23 = vmul.f32 0.125, %v416_v22 }
 0x3d7   :  { %v418_v24 = vadd.f32 1e-05, %v417_v23 }
 0x3d9   :  { %819 = vrsqrt.f32 %v418_v24 }
 0x3da   :  { %821 = vtanh.f32 %v395_v25 }
 0x3e3   :  { %v820_v26 = vpop.eup %819 }
 0x3e4   :  { %v420_v27 = vmul.f32 %v820_v26, %v408_v15  ;;  %v822_v30 = vpop.eup %821 }
 0x3e6   :  { %v421_v28 = vmul.f32 %v420_v27, %v304_v57 }
 0x3e8   :  { %v422_v29 = vadd.f32 %v421_v28, %v308_v59 }
 0x3ea   :  { %727 = vmatprep.mubr.msk.f32.mxu1 %vm280_vm15, %v422_v29 }
 0x3eb   :  { %728 = vmatmul.mubr.msk.f32.vlgmr.msra.gmra.mrb[4].mxu1 %vm280_vm15, %v822_v30 }
 0x3ec   :  { %736 = vmatprep.mubr.msk.f32.mxu1 %vm867_vm0, %v868_v39  ;;  %vm607_vm0 = vcmask 57344  }
 0x4be   :  { %v729_v2 = vpop.f32.mrb[4].mxu1 }
 0x4bf   :  { %v505_v32 = vadd.f32 %v729_v2, %v425_v31  ;;  %v499_v33 = vpop.f32.mrb[5].mxu1 }
 0x4c0   :  { %v500_v34 = vadd.f32 %v499_v33, %v425_v31 }
 0x4c1   :  { %823 = vtanh.f32 %v505_v32 }
 0x4c2   :  { %825 = vtanh.f32 %v500_v34 }
 0x4cb   :  { %v824_v35 = vpop.eup %823 }
 0x4cc   :  { %v826_v36 = vpop.eup %825  ;;  %v512_v41 = vmul.f32 %v824_v35, %v824_v35 }
 0x4cd   :  { %v510_v37 = vmul.f32 %v826_v36, %v824_v35  ;;  %v511_v38 = vmul.f32 %v826_v36, %v826_v36 }
 0x4cf   :  { %v773_v40 = vpack.c.bf16 %v511_v38, %v510_v37 }
 0x4d1   :  { %775 = vmatpush3.bf16.xpose.msk.msra.mxu1 %vm774_vm1, %v773_v40 }
 0x4d2   :  { %734 = vmatprep.subr.mxu1 %v868_v39 }
 0x4d9   :  { %735 = vmatpush3.xpose.msk.msra.mxu1 %vm280_vm15, %v512_v41 }
 0x4dc   :  { %737 = vmatmul.mubr.msk.f32.vlgmr.msra.gmra.mrb[6].mxu1 %vm280_vm15, %v874_v42 }
 0x5af   :  { %v591_v43 = vpop.f32.mrb[6].mxu1 }
 0x5b0   :  { %596 = vrot.lane.b32.xlu0 %v591_v43, %s872_s5  ;;  %v738_v44 = vpop.f32.mrb[7].mxu1 }
 0x622   :  { %v597_v45 = vpop.permute.xlu0 %596 }
 0x623   :  { %v599_v46 = vmul.f32 %v597_v45, %v591_v43 }
 0x625   :  { %v600_v47 = vmax.f32 %v599_v46, 1e-16 }
 0x627   :  { %827 = vrsqrt.f32 %v600_v47 }
 0x631   :  { %v828_v48 = vpop.eup %827 }
 0x632   :  { %603 = vrot.lane.b32.xlu1 %v828_v48, %s872_s5 }
 0x6a4   :  { %v604_v39 = vpop.permute.xlu1 %603 }
 0x6a5   :  { %v606_v49 = vmul.f32 %v604_v39, %v591_v43 }
 0x6a7   :  { %608 = vst.msk [vmem:[#allocation2] sm:$0x1] %vm607_vm0, %v606_v49 }
 0x6a8   :  { %840 = shalt.err (!%p837_p4)
}
 0x6a9   :  { %s841_s30 = scalar_lea.hbm %s1074_s6, 16 }
 0x6aa   :  { %p842_p5 = scmp.ne.s32.totalorder %s1074_s6, %s841_s30  ;;  %p845_p6 = scmp.lt.u32.totalorder %s841_s30, %s1074_s6 }
 0x6ac   :  { %p847_p7 = pnand %p845_p6, %p842_p5 }
 0x6ae   :  { %850 = shalt.err (!%p847_p7)
}
 0x6af   :  { %618 = dma.vmem_to_hbm [thread:$0]  %s616_s25, 16, %s1074_s6, [#allocation3]  }
 0x6b0   :  { %851 = dma.done.wait [#allocation3], 16  }
 0x6b1   :  { %852 = vsyncadd [#allocation3], 4294967280 }
 0x6b2   :  { %622 = vsyncpa [#allocation3], 1 }

</bundles_post_ra>
